<compile_context>
chip_gen: v7x
topology: tpu7x:2x2x1
jax: 0.10.0
libtpu: 0.0.40
codegen_flags: <defaults>
</compile_context>

<pallas_src>
import math

import jax
import jax.numpy as jnp
from jax.experimental import pallas as pl
from jax.experimental.pallas import tpu as pltpu


def self_attention_kernel(session_ref, mask_row_ref, negcol_ref, w_ref, out_ref):
    Bt, L, _ = mask_row_ref.shape          # (Bt, L, 1)
    E = w_ref.shape[0]                     # (E, 3E)

    s = session_ref[...]                   # (Bt*L, E) bf16
    w = w_ref[...]                         # (E, 3E)  bf16, resident across grid

    # Single fused Q/K/V projection on the MXU (bf16 operands, f32 accumulate)
    # + ReLU.  1/sqrt(E) is already folded into the wq columns of `w`.
    qkv = jnp.dot(s, w, preferred_element_type=jnp.float32)
    qkv = jnp.maximum(qkv, 0.0)            # (Bt*L, 3E) f32

    # Leading-dim split (Bt*L, E) -> (Bt, L, E) is sublane-aligned (Bt*L % 16 == 0).
    q = qkv[:, 0 * E:1 * E].reshape(Bt, L, E).astype(jnp.bfloat16)
    k = qkv[:, 1 * E:2 * E].reshape(Bt, L, E).astype(jnp.bfloat16)
    v = qkv[:, 2 * E:3 * E].reshape(Bt, L, E).astype(jnp.bfloat16)

    # alpha[b] = q[b] @ k[b]^T (already includes 1/sqrt(E)): batched contraction
    # over the last dims — handled natively by the MXU, no explicit transpose.
    alpha = jax.lax.dot_general(
        q, k,
        dimension_numbers=(((2,), (2,)), ((0,), (0,))),
        preferred_element_type=jnp.float32)                  # (Bt, L, L) f32

    # Key-column additive mask, precomputed in the wrapper as (mask - 1) * 2e32.
    # The query-row additive mask of the original forward is omitted: those rows
    # are zeroed below by the multiplicative row mask, so the result is identical.
    alpha = alpha + negcol_ref[...]                          # (Bt, 1, L) broadcast

    # Numerically stable softmax over keys (f32).  The query-row multiplicative
    # mask is folded into the 1/denominator factor (small (Bt, L, 1) multiply).
    alpha_max = jnp.max(alpha, axis=-1, keepdims=True)
    ex = jnp.exp(alpha - alpha_max)
    denom = jnp.sum(ex, axis=-1, keepdims=True)
    scale = pl.reciprocal(denom, approx=True) * mask_row_ref[...]   # (Bt, L, 1)
    p = (ex * scale).astype(jnp.bfloat16)                           # (Bt, L, L)

    # out[b] = p[b] @ v[b]  ->  (Bt, L, E), stored flattened as (Bt*L, E).
    out = jax.lax.dot_general(
        p, v,
        dimension_numbers=(((2,), (1,)), ((0,), (0,))),
        preferred_element_type=jnp.float32)
    out_ref[...] = out.reshape(Bt * L, E).astype(out_ref.dtype)


def self_attention(session, mask, wq, wk, wv, *, batch_tile=128, interpret=False):
    """Pallas TPU forward matching SelfAttention.forward.

    session: (B, L, E) float; mask: (B, L, 1) float (1 = valid, 0 = pad);
    wq/wk/wv: (E, E).  Returns (B, L, E) float32.
    """
    B, L, E = session.shape
    assert mask.shape == (B, L, 1), mask.shape
    session = session.astype(jnp.float32)
    mask = mask.astype(jnp.float32)

    # Fuse the three projection weights into one (E, 3E) matrix; fold the
    # 1/sqrt(E) attention scale into wq (relu commutes with a positive scale).
    inv_d = 1.0 / math.sqrt(E)
    w_qkv = jnp.concatenate([wq * inv_d, wk, wv], axis=1).astype(jnp.bfloat16)

    # Batch tile: Bt sessions per grid step; keep Bt*L a multiple of 16 so the
    # bf16 session slab block is sublane-tile aligned.
    mult = 16 // math.gcd(L, 16)
    Bt = max(1, min(batch_tile, B))
    Bt = -(-Bt // mult) * mult
    n_blocks = -(-B // Bt)
    Bp = n_blocks * Bt
    if Bp != B:
        pad = Bp - B
        session = jnp.pad(session, ((0, pad), (0, 0), (0, 0)))
        mask = jnp.pad(mask, ((0, pad), (0, 0), (0, 0)))  # padded sessions fully masked

    # Flattened bf16 slab fed to the projection matmul (halves HBM read traffic).
    session2d = session.reshape(Bp * L, E).astype(jnp.bfloat16)
    mask_row = mask                                           # (Bp, L, 1) f32 multiplicative
    neg_col = (jnp.swapaxes(mask, 1, 2) - 1.0) * 2e32         # (Bp, 1, L) f32 additive

    out2d = pl.pallas_call(
        self_attention_kernel,
        out_shape=jax.ShapeDtypeStruct((Bp * L, E), jnp.float32),
        grid_spec=pltpu.PrefetchScalarGridSpec(
            num_scalar_prefetch=0,
            grid=(n_blocks,),
            in_specs=[
                pl.BlockSpec((Bt * L, E), lambda b: (b, 0)),      # session slab (bf16)
                pl.BlockSpec((Bt, L, 1), lambda b: (b, 0, 0)),    # multiplicative row mask
                pl.BlockSpec((Bt, 1, L), lambda b: (b, 0, 0)),    # additive key-column mask
                pl.BlockSpec((E, 3 * E), lambda b: (0, 0)),       # fused weights (resident)
            ],
            out_specs=pl.BlockSpec((Bt * L, E), lambda b: (b, 0)),
        ),
        compiler_params=pltpu.CompilerParams(
            dimension_semantics=("parallel",),   # batch axis -> megacore / both TCs on v7x
        ),
        interpret=interpret,
    )(session2d, mask_row, neg_col, w_qkv)

    return out2d.reshape(Bp, L, E)[:B]


def self_attention_ref(session, mask, wq, wk, wv):
    # Pure-JAX (f32) reference mirroring the PyTorch forward exactly.
    att_mask = (mask - 1.0) * 2e32
    q = jax.nn.relu(session @ wq)
    k = jax.nn.relu(session @ wk)
    v = jax.nn.relu(session @ wv)
    alpha = jnp.einsum("ble,bme->blm", q, k) / math.sqrt(session.shape[-1])
    alpha = alpha + att_mask + jnp.swapaxes(att_mask, 1, 2)
    alpha = jax.nn.softmax(alpha, axis=2) * mask
    return alpha @ v


if __name__ == "__main__":
    B, L, E = 5, 8, 32   # batch, session_length, embedding_size (small demo shapes)

    key = jax.random.PRNGKey(0)
    k_s, k_q, k_k, k_v = jax.random.split(key, 4)

    # Deterministic parameter init matching reset_parameters(): U(-stdv, stdv)
    stdv = 1.0 / math.sqrt(E)
    wq = jax.random.uniform(k_q, (E, E), jnp.float32, -stdv, stdv)
    wk = jax.random.uniform(k_k, (E, E), jnp.float32, -stdv, stdv)
    wv = jax.random.uniform(k_v, (E, E), jnp.float32, -stdv, stdv)

    session = jax.random.normal(k_s, (B, L, E), jnp.float32)

    # Prefix-style validity mask: 1.0 for valid positions, 0.0 for padding.
    valid_lens = jnp.array([5, 8, 3, 1, 7], dtype=jnp.int32)
    mask = (jnp.arange(L)[None, :] < valid_lens[:, None]).astype(jnp.float32)
    mask = mask[:, :, None]   # (B, L, 1)

    # batch_tile=2 at this tiny B -> 3 grid steps (exercises tiling + batch padding).
    out = self_attention(session, mask, wq, wk, wv, batch_tile=2)
    out = jax.block_until_ready(out)

    ref = self_attention_ref(session, mask, wq, wk, wv)
    assert out.shape == (B, L, E)
    # bf16 MXU operands (f32 accumulation) -> loosened tolerance vs the f32 reference.
    assert jnp.allclose(out, ref, atol=5e-2, rtol=5e-2), "mismatch vs reference"

    print("KERNEL_OK")
</pallas_src>

<mosaic_0001>
module attributes {stable_mosaic.version = 11 : i64} {
  func.func @self_attention_kernel(%arg0: i32, %arg1: memref<16x32xbf16, #tpu.memory_space<vmem>>, %arg2: memref<2x8x1xf32, #tpu.memory_space<vmem>>, %arg3: memref<2x1x8xf32, #tpu.memory_space<vmem>>, %arg4: memref<32x96xbf16, #tpu.memory_space<vmem>>, %arg5: memref<16x32xf32, #tpu.memory_space<vmem>>) attributes {dimension_semantics = [#tpu.dimension_semantics<parallel>], iteration_bounds = array<i64: 3>, scalar_prefetch = 0 : i64, scratch_operands = 0 : i64, tpu.core_type = #tpu.core_type<tc>, window_params = [{transform_indices = @transform_0, window_bounds = array<i64: 16, 32>}, {transform_indices = @transform_1, window_bounds = array<i64: 2, 8, 1>}, {transform_indices = @transform_2, window_bounds = array<i64: 2, 1, 8>}, {pipeline_mode = #tpu.pipeline_mode<synchronous>, transform_indices = @transform_3, window_bounds = array<i64: 32, 96>}, {transform_indices = @transform_4, window_bounds = array<i64: 16, 32>}]} {
    %c0 = arith.constant 0 : index
    %c0_0 = arith.constant 0 : index
    %0 = vector.load %arg1[%c0, %c0_0] : memref<16x32xbf16, #tpu.memory_space<vmem>>, vector<16x32xbf16>
    %c0_1 = arith.constant 0 : index
    %c0_2 = arith.constant 0 : index
    %1 = vector.load %arg4[%c0_1, %c0_2] : memref<32x96xbf16, #tpu.memory_space<vmem>>, vector<32x96xbf16>
    %cst = arith.constant dense<0.000000e+00> : vector<16x96xf32>
    %2 = tpu.matmul %0, %1, %cst {dimension_numbers = #tpu.dot_dimension_numbers<[1], [0], [0], [1], [0, 0, 1, 1], [], []>} : vector<16x32xbf16>, vector<32x96xbf16>, vector<16x96xf32> -> vector<16x96xf32>
    %cst_3 = arith.constant 0.000000e+00 : f32
    %3 = vector.broadcast %cst_3 : f32 to vector<16x96xf32>
    %4 = arith.maximumf %2, %3 : vector<16x96xf32>
    %5 = vector.extract_strided_slice %4 {offsets = [0, 0], sizes = [16, 32], strides = [1, 1]} : vector<16x96xf32> to vector<16x32xf32>
    %6 = vector.shape_cast %5 : vector<16x32xf32> to vector<2x8x32xf32>
    %7 = arith.truncf %6 : vector<2x8x32xf32> to vector<2x8x32xbf16>
    %8 = vector.extract_strided_slice %4 {offsets = [0, 32], sizes = [16, 32], strides = [1, 1]} : vector<16x96xf32> to vector<16x32xf32>
    %9 = vector.shape_cast %8 : vector<16x32xf32> to vector<2x8x32xf32>
    %10 = arith.truncf %9 : vector<2x8x32xf32> to vector<2x8x32xbf16>
    %11 = vector.extract_strided_slice %4 {offsets = [0, 64], sizes = [16, 32], strides = [1, 1]} : vector<16x96xf32> to vector<16x32xf32>
    %12 = vector.shape_cast %11 : vector<16x32xf32> to vector<2x8x32xf32>
    %13 = arith.truncf %12 : vector<2x8x32xf32> to vector<2x8x32xbf16>
    %cst_4 = arith.constant dense<0.000000e+00> : vector<2x8x8xf32>
    %14 = tpu.matmul %7, %10, %cst_4 {dimension_numbers = #tpu.dot_dimension_numbers<[2], [2], [1], [1], [0, 0, 0, 1, 1, 1], [0], [0]>} : vector<2x8x32xbf16>, vector<2x8x32xbf16>, vector<2x8x8xf32> -> vector<2x8x8xf32>
    %c0_5 = arith.constant 0 : index
    %c0_6 = arith.constant 0 : index
    %c0_7 = arith.constant 0 : index
    %15 = vector.load %arg3[%c0_5, %c0_6, %c0_7] : memref<2x1x8xf32, #tpu.memory_space<vmem>>, vector<2x1x8xf32>
    %16 = vector.broadcast %15 : vector<2x1x8xf32> to vector<2x8x8xf32>
    %17 = arith.addf %14, %16 : vector<2x8x8xf32>
    %cst_8 = arith.constant dense<0xFF800000> : vector<2x8xf32>
    %18 = vector.multi_reduction <maximumf>, %17, %cst_8 [2] : vector<2x8x8xf32> to vector<2x8xf32>
    %19 = vector.shape_cast %18 : vector<2x8xf32> to vector<2x8x1xf32>
    %20 = vector.broadcast %19 : vector<2x8x1xf32> to vector<2x8x8xf32>
    %21 = arith.subf %17, %20 : vector<2x8x8xf32>
    %22 = math.exp %21 : vector<2x8x8xf32>
    %cst_9 = arith.constant dense<0.000000e+00> : vector<2x8xf32>
    %23 = vector.multi_reduction <add>, %22, %cst_9 [2] : vector<2x8x8xf32> to vector<2x8xf32>
    %24 = vector.shape_cast %23 : vector<2x8xf32> to vector<2x8x1xf32>
    %25 = tpu.reciprocal %24 {approx = true} : vector<2x8x1xf32> -> vector<2x8x1xf32>
    %c0_10 = arith.constant 0 : index
    %c0_11 = arith.constant 0 : index
    %c0_12 = arith.constant 0 : index
    %26 = vector.load %arg2[%c0_10, %c0_11, %c0_12] : memref<2x8x1xf32, #tpu.memory_space<vmem>>, vector<2x8x1xf32>
    %27 = arith.mulf %25, %26 : vector<2x8x1xf32>
    %28 = vector.broadcast %27 : vector<2x8x1xf32> to vector<2x8x8xf32>
    %29 = arith.mulf %22, %28 : vector<2x8x8xf32>
    %30 = arith.truncf %29 : vector<2x8x8xf32> to vector<2x8x8xbf16>
    %cst_13 = arith.constant dense<0.000000e+00> : vector<2x8x32xf32>
    %31 = tpu.matmul %30, %13, %cst_13 {dimension_numbers = #tpu.dot_dimension_numbers<[2], [1], [1], [2], [0, 0, 0, 1, 1, 2], [0], [0]>} : vector<2x8x8xbf16>, vector<2x8x32xbf16>, vector<2x8x32xf32> -> vector<2x8x32xf32>
    %32 = vector.shape_cast %31 : vector<2x8x32xf32> to vector<16x32xf32>
    %c0_14 = arith.constant 0 : index
    %c0_15 = arith.constant 0 : index
    %33 = vector.load %arg5[%c0_14, %c0_15] : memref<16x32xf32, #tpu.memory_space<vmem>>, vector<16x32xf32>
    tpu.vector_store %arg5[%c0_14, %c0_15], %32 {strides = array<i32>} : memref<16x32xf32, #tpu.memory_space<vmem>>, vector<16x32xf32>,
    return
  }
  func.func @transform_0(%arg0: i32) -> (i32, i32) {
    %c0_i32 = arith.constant 0 : i32
    %c0_i32_0 = arith.constant 0 : i32
    return %arg0, %c0_i32 : i32, i32
  }
  func.func @transform_1(%arg0: i32) -> (i32, i32, i32) {
    %c0_i32 = arith.constant 0 : i32
    %c0_i32_0 = arith.constant 0 : i32
    %c0_i32_1 = arith.constant 0 : i32
    return %arg0, %c0_i32, %c0_i32_0 : i32, i32, i32
  }
  func.func @transform_2(%arg0: i32) -> (i32, i32, i32) {
    %c0_i32 = arith.constant 0 : i32
    %c0_i32_0 = arith.constant 0 : i32
    %c0_i32_1 = arith.constant 0 : i32
    return %arg0, %c0_i32, %c0_i32_0 : i32, i32, i32
  }
  func.func @transform_3(%arg0: i32) -> (i32, i32) {
    %c0_i32 = arith.constant 0 : i32
    %c0_i32_0 = arith.constant 0 : i32
    %c0_i32_1 = arith.constant 0 : i32
    return %c0_i32, %c0_i32_0 : i32, i32
  }
  func.func @transform_4(%arg0: i32) -> (i32, i32) {
    %c0_i32 = arith.constant 0 : i32
    %c0_i32_0 = arith.constant 0 : i32
    return %arg0, %c0_i32 : i32, i32
  }
}

</mosaic_0001>

<bundles_post_ra>
// kernel: tpu_custom_call.1
= control target key start
LH: loop header
LB: loop body
LE: loop exit
PB: predicated region body
PF: predicated region fallthrough
CT: control target
= control target key end

     0   :  { %s773_s15 = smov 0   ;;  %s839_s0 = inlined_call_operand.vmem [shape: bf16[48,32], index: 0, kind: input, shape index: {}]   ;;  %s840_s1 = inlined_call_operand.vmem [shape: f32[6,8,1], index: 1, kind: input, shape index: {}]   ;;  %s841_s2 = inlined_call_operand.vmem [shape: f32[6,1,8], index: 2, kind: input, shape index: {}]   ;;  %s842_s3 = inlined_call_operand.vmem [shape: bf16[32,96], index: 3, kind: input, shape index: {}]   ;;  %s843_s4 = inlined_call_operand.vmem [shape: f32[48,32], index: 4, kind: output, shape index: {}]  }
   0x1 LB: > { %s642_s16 = sadd.s32 4294967295, %s741_s15   ;;  %p646_p0 = scmp.ge.s32.totalorder %s741_s15, 1  ;;  %s741_s15 = sphi %s773_s15, %s14_s15  }
   0x2   : > { %p184_p1 = scmp.lt.s32.totalorder %s741_s15, 4 }
   0x4   : > { %p185_p2 = pnand %p646_p0, %p184_p1 }
   0x5   : > { %v724_v0 = vld [vmem:[%s842_s3] sm:$0xff] (!%p185_p2)   ;;  %v743_v1 = vmov (!%p185_p2), 0.0   ;;  %v725_v2 = vld [vmem:[%s842_s3 + $0x8] sm:$0xff] (!%p185_p2)   ;;  %vm744_vm0 = vmmov (!%p185_p2), 0   ;;  %s647_s21 = sshll.u32 (!%p185_p2), %s642_s16, 1  ;;  %vm266_vm1 = vcmask (!%p185_p2), 261120  }
   0x6   : > { %188 = sbr.rel (%p185_p2) target bundleno = 1243 (0x4db), region = 36  ;;  %677 = vmatprep.subr.bf16.mxu0 (!%p185_p2), %v743_v1  ;;  %685 = vmatprep.subr.bf16.mxu1 (!%p185_p2), %v743_v1  ;;  %p220_p3 = scmp.lt.s32.totalorder (!%p185_p2), %s647_s21, 5  ;;  %vm427_vm2 = vcmask (!%p185_p2), 64512   ;;  %v746_v40 = vmov (!%p185_p2), 0   ;;  %vm471_vm3 = vcmask (!%p185_p2), 1043456  }
   0x7   : > { %678 = vmatpush3.bf16.msra.mxu0 (!%p185_p2), %v724_v0  ;;  %681 = vmatprep.mubr.msk.bf16.mxu0 (!%p185_p2), %vm744_vm0, %v743_v1  ;;  %s745_s26 = smov (!%p185_p2), 96   ;;  %s747_s8 = smov (!%p185_p2), 64  }
   0x8   : > { %679 = vmatprep.subr.bf16.mxu0 (!%p185_p2), %v743_v1  ;;  %687 = vmatprep.mubr.msk.bf16.mxu1 (!%p185_p2), %vm744_vm0, %v743_v1 }
   0x9   : > { %722 = vset.pattern.permute.xlu1 (!%p185_p2), %v746_v40  ;;  %723 = vset.pattern.permute.xlu0 (!%p185_p2), %v746_v40 }
   0xb   : > { %680 = vmatpush3.bf16.msra.mxu0 (!%p185_p2), %v725_v2 }
   0xc   : > { %691 = vmatprep.subr.bf16.mxu0 (!%p185_p2), %v743_v1 }
   0xd   : > { %s845_s21 = smov (!%p220_p3, %s647_s21), 5 }
   0xe   : > { %s648_s22 = sshll.u32 %s845_s21, 2  ;;  %s234_s29 = scalar_lea.vmem %s841_s2, %s845_s21 }
   0xf   : > { %s223_s25 = scalar_lea.vmem %s839_s0, %s648_s22  ;;  %v658_v16 = vld [vmem:[%s234_s29] ss:$0 sm:$0xff]  ;;  %v659_v21 = vld [vmem:[%s234_s29 + $0x1] ss:$0 sm:$0xff]  ;;  %s650_s30 = sshll.u32 %s845_s21, 3 }
  0x10   : > { %v726_v3 = vld [vmem:[%s223_s25] sm:$0xff]   ;;  %s229_s7 = scalar_lea.vmem %s840_s1, %s650_s30  ;;  %s240_s11 = scalar_lea.vmem %s843_s4, %s650_s30 }
  0x11   : > { %682 = vmatmul.mubr.msk.bf16.vlgmr.msra.gmra.mrb[0].mxu0 %vm266_vm1, %v726_v3  ;;  %v448_v43 = vld [vmem:[%s229_s7] sm:$0xff]  ;;  %v449_v46 = vld [vmem:[%s229_s7 + $0x8] sm:$0xff] }
  0x12   : > { %693 = vmatprep.mubr.msk.bf16.mxu0 %vm744_vm0, %v743_v1 }
  0xe4   : > { %v304_v4 = vpop.f32.mrb[0].mxu0 }
  0xe5   : > { %v311_v5 = vmax.f32 %v304_v4, 0.0  ;;  %v683_v6 = vpop.f32.mrb[1].mxu0 }
  0xe6   : > { %v307_v7 = vpop.f32.mrb[2].mxu0 }
  0xe7   : > { %v797_v8 = vpack.c.bf16 %v311_v5, %v311_v5  ;;  %v312_v9 = vmax.f32 %v307_v7, 0.0  ;;  %v684_v10 = vpop.f32.mrb[3].mxu0 }
  0xe9   : > { %330 = vrot.lane.b32.xlu0 %v797_v8, %s745_s26  ;;  %v800_v11 = vpack.c.bf16 %v312_v9, %v312_v9 }
  0xed   : > { %379 = vrot.lane.b32.xlu0 %v800_v11, %s745_s26 }
 0x15b   : > { %v331_v12 = vpop.permute.xlu0 %330 }
 0x15c   : > { %v336_v13 = vsel %vm266_vm1, %v331_v12, 0 }
 0x15d   : > { %686 = vmatpush3.bf16.xpose.msra.mxu1 %v336_v13 }
 0x15e   : > { %697 = vmatprep.subr.bf16.mxu1 %v743_v1 }
 0x15f   : > { %v380_v14 = vpop.permute.xlu0 %379 }
 0x160   : > { %v385_v15 = vsel %vm266_vm1, %v380_v14, 0 }
 0x161   : > { %692 = vmatpush3.bf16.xpose.msra.mxu0 %v385_v15 }
 0x162   : > { %703 = vmatprep.subr.bf16.mxu0 %v743_v1 }
 0x164   : > { %688 = vmatmul.mubr.msk.bf16.vlgmr.msra.gmra.mrb[0].mxu1 %vm266_vm1, %v797_v8 }
 0x165   : > { %699 = vmatprep.mubr.msk.bf16.mxu1 %vm744_vm0, %v743_v1 }
 0x168   : > { %694 = vmatmul.mubr.msk.bf16.vlgmr.msra.gmra.mrb[4].mxu0 %vm266_vm1, %v800_v11 }
 0x169   : > { %705 = vmatprep.mubr.msk.bf16.mxu0 %vm744_vm0, %v743_v1 }
 0x237   : > { %v372_v17 = vpop.f32.mrb[0].mxu1 }
 0x238   : > { %v373_v18 = vadd.f32 %v658_v16, %v372_v17  ;;  %v689_v19 = vpop.f32.mrb[1].mxu1 }
 0x239   : > { %v375_v20 = vpop.f32.mrb[2].mxu1 }
 0x23a   : > { %v690_v22 = vpop.f32.mrb[3].mxu1  ;;  %v428_v23 = vsel %vm427_vm2, %v373_v18, -inf }
 0x23b   : > { %429 = vmax.xlane.f32.xlu1 %v428_v23  ;;  %v421_v24 = vpop.f32.mrb[4].mxu0 }
 0x23c   : > { %v422_v25 = vadd.f32 %v659_v21, %v421_v24  ;;  %v695_v26 = vpop.f32.mrb[5].mxu0 }
 0x23d   : > { %v424_v27 = vpop.f32.mrb[6].mxu0 }
 0x23e   : > { %v696_v28 = vpop.f32.mrb[7].mxu0  ;;  %v431_v29 = vsel %vm427_vm2, %v422_v25, -inf }
 0x23f   : > { %432 = vmax.xlane.f32.xlu1 %v431_v29 }
 0x2c8   : > { %v430_v30 = vpop.xlane.xlu1 %429 }
 0x2c9   : > { %v434_v31 = vsub.f32 %v373_v18, %v430_v30 }
 0x2cb   : > { %v436_v32 = vmul.f32 1.442695, %v434_v31 }
 0x2cc   : > { %v433_v33 = vpop.xlane.xlu1 %432 }
 0x2cd   : > { %727 = vpow2.f32 %v436_v32  ;;  %v435_v34 = vsub.f32 %v422_v25, %v433_v33 }
 0x2cf   : > { %v438_v35 = vmul.f32 1.442695, %v435_v34 }
 0x2d1   : > { %729 = vpow2.f32 %v438_v35 }
 0x2d7   : > { %v728_v36 = vpop.eup %727 }
 0x2d8   : > { %v440_v37 = vsel %vm427_vm2, %v728_v36, 0.0 }
 0x2d9   : > { %441 = vadd.xlane.f32.xlu0 %v440_v37 }
 0x2db   : > { %v730_v38 = vpop.eup %729 }
 0x2dc   : > { %v443_v39 = vsel %vm427_vm2, %v730_v38, 0.0 }
 0x2dd   : > { %444 = vadd.xlane.f32.xlu1 %v443_v39 }
 0x366   : > { %v442_v41 = vpop.xlane.xlu0 %441 }
 0x367   : > { %731 = vrcp.f32 %v442_v41 }
 0x36a   : > { %v445_v42 = vpop.xlane.xlu1 %444 }
 0x36b   : > { %733 = vrcp.f32 %v445_v42 }
 0x371   : > { %v732_v44 = vpop.eup %731 }
 0x372   : > { %v450_v45 = vmul.f32 %v732_v44, %v448_v43 }
 0x374   : > { %454 = vperm.xlu1 %722, %v450_v45  }
 0x375   : > { %v734_v47 = vpop.eup %733 }
 0x376   : > { %v451_v48 = vmul.f32 %v734_v47, %v449_v46 }
 0x378   : > { %459 = vperm.xlu1 %722, %v451_v48  }
 0x37c   : > { %466 = vrot.lane.b32.xlu1 %v797_v8, %s747_s8 }
 0x380   : > { %515 = vrot.lane.b32.xlu1 %v800_v11, %s747_s8 }
 0x3f3   : > { %v455_v49 = vpop.permute.xlu1 %454 }
 0x3f4   : > { %v462_v51 = vmul.f32 %v728_v36, %v455_v49 }
 0x3f6   : > { %v464_v54 = vpack.c.bf16 %v462_v51, %v462_v51 }
 0x3f7   : > { %v460_v50 = vpop.permute.xlu1 %459 }
 0x3f8   : > { %v463_v55 = vmul.f32 %v730_v38, %v460_v50 }
 0x3fa   : > { %v465_v58 = vpack.c.bf16 %v463_v55, %v463_v55 }
 0x3fb   : > { %v467_v52 = vpop.permute.xlu1 %466 }
 0x3fc   : > { %v473_v53 = vsel %vm471_vm3, %v467_v52, 0 }
 0x3fd   : > { %698 = vmatpush3.bf16.msra.mxu1 %v473_v53 }
 0x3ff   : > { %v516_v56 = vpop.permute.xlu1 %515 }
 0x400   : > { %v521_v57 = vsel %vm471_vm3, %v516_v56, 0  ;;  %700 = vmatmul.mubr.msk.bf16.vlgmr.msra.gmra.mrb[4].mxu1 %vm427_vm2, %v464_v54 }
 0x401   : > { %704 = vmatpush3.bf16.msra.mxu0 %v521_v57 }
 0x404   : > { %706 = vmatmul.mubr.msk.bf16.vlgmr.msra.gmra.mrb[8].mxu0 %vm427_vm2, %v465_v58 }
 0x4d3   : > { %v509_v59 = vpop.f32.mrb[4].mxu1 }
 0x4d4   : > { %563 = vst.msk [vmem:[%s240_s11] sm:$0xff] %vm266_vm1, %v509_v59  ;;  %v701_v60 = vpop.f32.mrb[5].mxu1 }
 0x4d5   : > { %v512_v61 = vpop.f32.mrb[6].mxu1 }
 0x4d6   : > { %v702_v62 = vpop.f32.mrb[7].mxu1 }
 0x4d7   : > { %v557_v63 = vpop.f32.mrb[8].mxu0 }
 0x4d8   : > { %564 = vst.msk [vmem:[%s240_s11 + $0x8] sm:$0xff] %vm266_vm1, %v557_v63  ;;  %v707_v0 = vpop.f32.mrb[9].mxu0 }
 0x4d9   : > { %v560_v1 = vpop.f32.mrb[10].mxu0 }
 0x4da   : > { %v708_v2 = vpop.f32.mrb[11].mxu0 }
 0x4db PF: > { %s14_s15 = sadd.s32 1, %s741_s15  }
 0x4dc   : > { %p11_p4 = scmp.ge.s32.totalorder %s14_s15, 5  }
 0x4de   :  { %13 = sbr.rel (!%p11_p4) target bundleno = 1 (0x1), region = 72 }

</bundles_post_ra>
